<compile_context>
chip_gen: v7x
topology: tpu7x:2x2x1
jax: 0.10.0
libtpu: 0.0.40
codegen_flags: <defaults>
</compile_context>

<pallas_src>
import math

import jax
import jax.numpy as jnp
from jax import lax
from jax.experimental import pallas as pl
from jax.experimental.pallas import tpu as pltpu

BIG = 1e12


def _make_kernel(S, D, TQ, E_BLK, neg_big):
    D2 = D // 2
    EBD = E_BLK * D

    def rope(x, cos, sin):
        # Rotate-half within each entity's contiguous D-wide column block, done on
        # the full (rows, EBD) tensor: output col j takes col j+D2 in the first half
        # of its block and col j-D2 in the second half.  Two XLU rolls + one select
        # (no lane-crossing concatenates).  Sin already carries the [-sin|+sin] sign.
        r_plus = pltpu.roll(x, shift=D2, axis=1)          # col j <- x[:, j - D2]
        r_minus = pltpu.roll(x, shift=EBD - D2, axis=1)   # col j <- x[:, j + D2]
        col = lax.broadcasted_iota(jnp.int32, x.shape, 1)
        rot = jnp.where((col % D) < D2, r_minus, r_plus)
        return x * cos + rot * sin

    def kernel(x_ref, pad_col_ref, pad_row_ref, wq_ref, wk_ref, bq_ref, bk_ref,
               cos_ref, sin_ref, o_ref, k_scr):
        # x_ref:       (1, S, H)     hidden states for batch b (bf16)
        # pad_col_ref: (1, S, 1)     attention mask as a column (f32, key axis)
        # pad_row_ref: (1, 1, S)     attention mask as a row    (f32, key axis)
        # wq_ref:      (1, H, EBD)   q-projection slab, 1/sqrt(D) folded (bf16)
        # wk_ref:      (1, H, EBD)   k-projection slab (bf16)
        # bq_ref:      (1, 1, EBD)   q bias, scaled (f32)   bk_ref: k bias (f32)
        # cos_ref:     (S, EBD)      RoPE cos, tiled per entity, de-interleaved layout
        # sin_ref:     (S, EBD)      RoPE sin, tiled, sign folded ([-sin | +sin])
        # o_ref:       (1, E_BLK, TQ, S) logits block
        # k_scr:       (E_BLK, S, D) bf16 scratch: RoPE'd + pad-masked keys
        qi = pl.program_id(2)

        # Build the key slab once per (batch, entity-block); it stays resident in
        # VMEM scratch across all query tiles.
        # NOTE: this relies on the qi grid axis being the innermost, sequentially
        # iterated ("arbitrary") axis -- do not mark it "parallel" or reorder the
        # grid, or k_scr would be stale for qi > 0.
        @pl.when(qi == 0)
        def _():
            cos = cos_ref[...]
            sin = sin_ref[...]
            kproj = jnp.dot(x_ref[0], wk_ref[0],
                            preferred_element_type=jnp.float32) + bk_ref[0]   # (S, EBD) f32
            k_rope = rope(kproj, cos, sin)
            # fold the multiplicative pad mask into the keys (exact: pad is 0/1),
            # cast once on the lane-dense full-width array.
            k_bf = (k_rope * pad_col_ref[0]).astype(k_scr.dtype)              # (S, EBD)
            for e in range(E_BLK):
                k_scr[e] = k_bf[:, e * D:(e + 1) * D]

        q0 = pl.multiple_of(qi * TQ, TQ)
        xq = x_ref[0, pl.ds(q0, TQ), :]                                        # (TQ, H) bf16
        qproj = jnp.dot(xq, wq_ref[0],
                        preferred_element_type=jnp.float32) + bq_ref[0]        # (TQ, EBD) f32
        cos_q = cos_ref[pl.ds(q0, TQ), :]
        sin_q = sin_ref[pl.ds(q0, TQ), :]
        q_bf = rope(qproj, cos_q, sin_q).astype(jnp.bfloat16)                  # (TQ, EBD)

        # In-kernel additive mask: (-(1 - pad_key) - tril) * BIG * scale.
        # Built from iota compares + the resident pad row -> no (B,S,S) HBM stream.
        row = q0 + lax.broadcasted_iota(jnp.int32, (TQ, S), 0)
        colm = lax.broadcasted_iota(jnp.int32, (TQ, S), 1)
        tril = (colm < row).astype(jnp.float32)
        am = ((pad_row_ref[0] - 1.0) - tril) * neg_big                          # (TQ, S)

        for e in range(E_BLK):
            # q @ k^T as an NT dot_general -- no materialized transpose of k.
            logits = lax.dot_general(
                q_bf[:, e * D:(e + 1) * D], k_scr[e],
                dimension_numbers=(((1,), (1,)), ((), ())),
                preferred_element_type=jnp.float32)                            # (TQ, S)
            o_ref[0, e] = (logits + am).astype(o_ref.dtype)

    return kernel


def _vmem_capacity_bytes():
    """Per-TensorCore VMEM capacity; conservative 64 MiB fallback (works on all gens)."""
    try:
        info = pltpu.get_tpu_info()
        for name in ("vmem_capacity_bytes", "vmem_size_bytes", "vmem_bytes"):
            v = getattr(info, name, None)
            if v:
                return int(v)
    except Exception:
        pass
    return 64 << 20


def _vmem_estimate(S, H, D, TQ, E_BLK, out_bytes):
    """Rough VMEM footprint of the chosen tiling (double-buffered inputs/outputs)."""
    bf2, f4 = 2, 4
    ebd = E_BLK * D
    est = 0
    est += 2 * S * H * bf2                    # x
    est += 2 * S * f4 + 2 * S * f4            # pad column + pad row
    est += 2 * 2 * H * ebd * bf2              # Wq, Wk slabs
    est += 2 * 2 * ebd * f4                   # biases
    est += 2 * 2 * S * ebd * f4               # cos, sin (tiled, lane-dense)
    est += 2 * E_BLK * TQ * S * out_bytes     # output tile
    est += E_BLK * S * D * bf2                # key scratch
    est += 3 * S * ebd * f4 + 2 * TQ * S * f4  # in-kernel f32 working set (proj/rolls/logits)
    return int(est * 1.2) + (2 << 20)         # headroom for tile padding / relayouts


def _divisors_desc(n):
    return [d for d in range(n, 0, -1) if n % d == 0]


def _pick_tiles(S, H, E, D, vmem_cap, out_bytes):
    """Pick (TQ, E_BLK) jointly: minimize grid steps within ~70% of VMEM capacity.

    No artificial cap on E_BLK*D (wider projection N just means more MXU passes);
    prefer collapsing the query axis (TQ=S) when the budget allows.
    """
    budget = int(vmem_cap * 0.70)
    tq_cands = [t for t in _divisors_desc(S) if t == S or t % 8 == 0]
    if not tq_cands:
        tq_cands = [S]
    best = None
    for e_blk in _divisors_desc(E):
        for tq in tq_cands:
            est = _vmem_estimate(S, H, D, tq, e_blk, out_bytes)
            if est > budget:
                continue
            steps = (E // e_blk) * (S // tq)
            key = (steps, -tq, -e_blk)
            if best is None or key < best[0]:
                best = (key, tq, e_blk)
    if best is None:
        return tq_cands[-1], 1                # smallest tiles; best effort
    return best[1], best[2]


def global_pointer_forward(last_hidden, attention_mask, W, b, *,
                           ent_type_size, inner_dim, out_dtype=jnp.float32):
    """last_hidden: [B, S, H] f32; attention_mask: [B, S]; W: [H, E*2D]; b: [E*2D]."""
    B, S, H = last_hidden.shape
    E, D = ent_type_size, inner_dim
    assert D % 2 == 0, "RoPE inner_dim must be even"
    D2 = D // 2
    scale = 1.0 / math.sqrt(D)
    out_bytes = jnp.dtype(out_dtype).itemsize

    vmem_cap = _vmem_capacity_bytes()
    TQ, E_BLK = _pick_tiles(S, H, E, D, vmem_cap, out_bytes)
    NB = E // E_BLK
    EBD = E_BLK * D
    # NOTE: for prime/odd E this degrades to E_BLK=1; padding E up to a multiple of
    # a wider E_BLK with zero weight slabs would avoid that at the cost of an output
    # slice copy -- not done here to keep the output write exact-shaped.

    # De-interleave permutation: even RoPE dims first, odd dims second (per entity).
    # The logits contraction is invariant to this permutation (q and k share it).
    perm = jnp.concatenate([jnp.arange(0, D, 2), jnp.arange(1, D, 2)])

    W3 = W.reshape(H, E, 2 * D)
    Wq = W3[..., :D][..., perm] * scale                # fold 1/sqrt(D) into q weights
    Wk = W3[..., D:][..., perm]
    b3 = b.reshape(E, 2 * D)
    bq = (b3[:, :D][:, perm] * scale).astype(jnp.float32)   # (E, D)
    bk = b3[:, D:][:, perm].astype(jnp.float32)

    def to_blocks(w):                                  # (H, E, D) -> (NB, H, E_BLK*D)
        w = jnp.transpose(w, (1, 0, 2))                # (E, H, D)
        w = w.reshape(NB, E_BLK, H, D).transpose(0, 2, 1, 3).reshape(NB, H, EBD)
        return w

    Wq_b = to_blocks(Wq).astype(jnp.bfloat16)
    Wk_b = to_blocks(Wk).astype(jnp.bfloat16)
    bq_b = bq.reshape(NB, 1, EBD)
    bk_b = bk.reshape(NB, 1, EBD)

    # RoPE tables: de-interleaved layout, sign folded into sin, tiled per entity so
    # the kernel applies RoPE once on the full lane-dense (rows, EBD) projection.
    pos = jnp.arange(S, dtype=jnp.float32)[:, None]
    idx = jnp.arange(D2, dtype=jnp.float32)
    theta = jnp.power(10000.0, -2.0 * idx / D)
    ang = pos * theta                                               # (S, D/2)
    cos_blk = jnp.concatenate([jnp.cos(ang), jnp.cos(ang)], axis=-1)    # (S, D)
    sin_blk = jnp.concatenate([-jnp.sin(ang), jnp.sin(ang)], axis=-1)   # (S, D)
    cos_full = jnp.tile(cos_blk, (1, E_BLK))                        # (S, EBD)
    sin_full = jnp.tile(sin_blk, (1, E_BLK))

    pad = attention_mask.astype(jnp.float32)                        # (B, S)
    pad_col = pad[:, :, None]                                       # (B, S, 1)
    pad_row = pad[:, None, :]                                       # (B, 1, S)
    x_bf = last_hidden.astype(jnp.bfloat16)

    est = _vmem_estimate(S, H, D, TQ, E_BLK, out_bytes)
    vmem_limit = int(min(vmem_cap * 0.9, max(32 << 20, est + (16 << 20))))

    flops = int(2 * B * S * H * (2 * E * D) + 2 * B * E * S * S * D)
    bytes_accessed = int(B * S * H * 2 + B * 2 * H * E * D * 2 + 2 * S * EBD * 4
                         + B * S * 4 * 2 + B * E * S * S * out_bytes)

    kernel = _make_kernel(S=S, D=D, TQ=TQ, E_BLK=E_BLK, neg_big=BIG * scale)
    grid = (B, NB, S // TQ)

    return pl.pallas_call(
        kernel,
        out_shape=jax.ShapeDtypeStruct((B, E, S, S), out_dtype),
        grid=grid,
        in_specs=[
            pl.BlockSpec((1, S, H), lambda bi, ei, qi: (bi, 0, 0)),     # x (resident per b)
            pl.BlockSpec((1, S, 1), lambda bi, ei, qi: (bi, 0, 0)),     # pad column
            pl.BlockSpec((1, 1, S), lambda bi, ei, qi: (bi, 0, 0)),     # pad row
            pl.BlockSpec((1, H, EBD), lambda bi, ei, qi: (ei, 0, 0)),   # Wq slab
            pl.BlockSpec((1, H, EBD), lambda bi, ei, qi: (ei, 0, 0)),   # Wk slab
            pl.BlockSpec((1, 1, EBD), lambda bi, ei, qi: (ei, 0, 0)),   # bq
            pl.BlockSpec((1, 1, EBD), lambda bi, ei, qi: (ei, 0, 0)),   # bk
            pl.BlockSpec((S, EBD), lambda bi, ei, qi: (0, 0)),          # cos (resident)
            pl.BlockSpec((S, EBD), lambda bi, ei, qi: (0, 0)),          # sin (resident)
        ],
        out_specs=pl.BlockSpec((1, E_BLK, TQ, S), lambda bi, ei, qi: (bi, ei, qi, 0)),
        scratch_shapes=[pltpu.VMEM((E_BLK, S, D), jnp.bfloat16)],       # RoPE'd keys
        compiler_params=pltpu.CompilerParams(
            # qi MUST remain the innermost "arbitrary" axis: the key scratch built
            # under pl.when(qi==0) is reused across all query tiles of a (b, e-block).
            dimension_semantics=("parallel", "parallel", "arbitrary"),
            vmem_limit_bytes=vmem_limit,
        ),
        cost_estimate=pl.CostEstimate(flops=flops, transcendentals=0,
                                      bytes_accessed=bytes_accessed),
    )(x_bf, pad_col, pad_row, Wq_b, Wk_b, bq_b, bk_b, cos_full, sin_full)


def _rope_tables_ref(S, D, dtype=jnp.float32):
    # matches sinusoidal_position_embedding + the repeat_interleave(2) slicing
    pos = jnp.arange(S, dtype=dtype)[:, None]
    idx = jnp.arange(D // 2, dtype=dtype)
    theta = jnp.power(10000.0, -2.0 * idx / D)
    ang = pos * theta
    cos_pos = jnp.repeat(jnp.cos(ang), 2, axis=-1)
    sin_pos = jnp.repeat(jnp.sin(ang), 2, axis=-1)
    return cos_pos, sin_pos


def global_pointer_reference(last_hidden, attention_mask, W, b, *, ent_type_size, inner_dim):
    """Pure-JAX reference, mirroring the PyTorch forward exactly (f32 throughout)."""
    B, S, H = last_hidden.shape
    E, D = ent_type_size, inner_dim
    out = last_hidden @ W + b                                   # (B, S, E*2D)
    out = out.reshape(B, S, E, 2 * D)
    qw, kw = out[..., :D], out[..., D:]

    cos_pos, sin_pos = _rope_tables_ref(S, D)
    cos_pos = cos_pos[None, :, None, :]
    sin_pos = sin_pos[None, :, None, :]

    def rot(v):
        v2 = jnp.stack([-v[..., 1::2], v[..., ::2]], axis=-1)
        return v2.reshape(v.shape)

    qw = qw * cos_pos + rot(qw) * sin_pos
    kw = kw * cos_pos + rot(kw) * sin_pos

    logits = jnp.einsum('bmhd,bnhd->bhmn', qw, kw)
    pad = attention_mask.astype(jnp.float32)[:, None, None, :]  # mask key positions
    pad = jnp.broadcast_to(pad, (B, E, S, S))
    logits = logits * pad - (1.0 - pad) * BIG
    tri = jnp.tril(jnp.ones((S, S), jnp.float32), -1)
    logits = logits - tri[None, None] * BIG
    return logits / (D ** 0.5)


if __name__ == "__main__":
    B, S, H = 2, 8, 32
    ENT_TYPES, INNER_DIM = 4, 16

    key = jax.random.PRNGKey(0)
    k_x, k_w, k_b = jax.random.split(key, 3)

    last_hidden = jax.random.normal(k_x, (B, S, H), dtype=jnp.float32)
    # deterministic "nn.Linear" params (stored transposed: [H, out_features])
    W = 0.02 * jax.random.normal(k_w, (H, ENT_TYPES * INNER_DIM * 2), dtype=jnp.float32)
    b = 0.02 * jax.random.normal(k_b, (ENT_TYPES * INNER_DIM * 2,), dtype=jnp.float32)
    # attention mask: batch 0 fully valid, batch 1 has 2 padded positions
    attention_mask = jnp.array([[1] * S, [1] * (S - 2) + [0] * 2], dtype=jnp.float32)

    out = global_pointer_forward(
        last_hidden, attention_mask, W, b,
        ent_type_size=ENT_TYPES, inner_dim=INNER_DIM,
    )
    out = jax.block_until_ready(out)

    ref = global_pointer_reference(
        last_hidden, attention_mask, W, b,
        ent_type_size=ENT_TYPES, inner_dim=INNER_DIM,
    )
    assert out.shape == (B, ENT_TYPES, S, S)

    # Compare only the entries that are NOT pushed to ~-1e12 by the pad / tril masks
    # (so real regressions aren't hidden by the huge masked magnitudes), and check
    # separately that masked entries are properly suppressed.
    pad_ok = attention_mask[:, None, None, :] > 0.5
    tri = jnp.tril(jnp.ones((S, S), jnp.float32), -1) > 0.5
    valid = pad_ok & (~tri[None, None])
    diff = jnp.abs(out - ref)
    tol = 2e-2 * jnp.abs(ref) + 2e-3          # bf16 MXU operands vs f32 reference
    assert bool(jnp.all(jnp.where(valid, diff <= tol, True))), "mismatch on unmasked logits"
    assert bool(jnp.all(jnp.where(valid, True, out < -1e10))), "masked logits not suppressed"
    print("KERNEL_OK")
</pallas_src>

<mosaic_0001>
module attributes {stable_mosaic.version = 11 : i64} {
  func.func @kernel(%arg0: i32, %arg1: i32, %arg2: i32, %arg3: memref<1x8x32xbf16, #tpu.memory_space<vmem>>, %arg4: memref<1x8x1xf32, #tpu.memory_space<vmem>>, %arg5: memref<1x1x8xf32, #tpu.memory_space<vmem>>, %arg6: memref<1x32x64xbf16, #tpu.memory_space<vmem>>, %arg7: memref<1x32x64xbf16, #tpu.memory_space<vmem>>, %arg8: memref<1x1x64xf32, #tpu.memory_space<vmem>>, %arg9: memref<1x1x64xf32, #tpu.memory_space<vmem>>, %arg10: memref<8x64xf32, #tpu.memory_space<vmem>>, %arg11: memref<8x64xf32, #tpu.memory_space<vmem>>, %arg12: memref<1x4x8x8xf32, #tpu.memory_space<vmem>>, %arg13: memref<4x8x16xbf16, #tpu.memory_space<vmem>>) attributes {dimension_semantics = [#tpu.dimension_semantics<parallel>, #tpu.dimension_semantics<parallel>, #tpu.dimension_semantics<arbitrary>], iteration_bounds = array<i64: 2, 1, 1>, scalar_prefetch = 0 : i64, scratch_operands = 1 : i64, tpu.core_type = #tpu.core_type<tc>, window_params = [{transform_indices = @transform_0, window_bounds = array<i64: 1, 8, 32>}, {transform_indices = @transform_1, window_bounds = array<i64: 1, 8, 1>}, {transform_indices = @transform_2, window_bounds = array<i64: 1, 1, 8>}, {transform_indices = @transform_3, window_bounds = array<i64: 1, 32, 64>}, {transform_indices = @transform_4, window_bounds = array<i64: 1, 32, 64>}, {transform_indices = @transform_5, window_bounds = array<i64: 1, 1, 64>}, {transform_indices = @transform_6, window_bounds = array<i64: 1, 1, 64>}, {pipeline_mode = #tpu.pipeline_mode<synchronous>, transform_indices = @transform_7, window_bounds = array<i64: 8, 64>}, {pipeline_mode = #tpu.pipeline_mode<synchronous>, transform_indices = @transform_8, window_bounds = array<i64: 8, 64>}, {transform_indices = @transform_9, window_bounds = array<i64: 1, 4, 8, 8>}]} {
    %c0_i32 = arith.constant 0 : i32
    %0 = arith.cmpi eq, %arg2, %c0_i32 : i32
    %1 = arith.extui %0 : i1 to i32
    %c0_i32_0 = arith.constant 0 : i32
    %2 = arith.cmpi ne, %1, %c0_i32_0 : i32
    scf.if %2 {
      %c0_50 = arith.constant 0 : index
      %c0_51 = arith.constant 0 : index
      %92 = vector.load %arg10[%c0_50, %c0_51] : memref<8x64xf32, #tpu.memory_space<vmem>>, vector<8x64xf32>
      %c0_52 = arith.constant 0 : index
      %c0_53 = arith.constant 0 : index
      %93 = vector.load %arg11[%c0_52, %c0_53] : memref<8x64xf32, #tpu.memory_space<vmem>>, vector<8x64xf32>
      %c0_54 = arith.constant 0 : index
      %c0_55 = arith.constant 0 : index
      %c0_56 = arith.constant 0 : index
      %94 = vector.load %arg3[%c0_54, %c0_55, %c0_56] : memref<1x8x32xbf16, #tpu.memory_space<vmem>>, vector<1x8x32xbf16>
      %95 = vector.shape_cast %94 : vector<1x8x32xbf16> to vector<8x32xbf16>
      %c0_57 = arith.constant 0 : index
      %c0_58 = arith.constant 0 : index
      %c0_59 = arith.constant 0 : index
      %96 = vector.load %arg7[%c0_57, %c0_58, %c0_59] : memref<1x32x64xbf16, #tpu.memory_space<vmem>>, vector<1x32x64xbf16>
      %97 = vector.shape_cast %96 : vector<1x32x64xbf16> to vector<32x64xbf16>
      %cst_60 = arith.constant dense<0.000000e+00> : vector<8x64xf32>
      %98 = tpu.matmul %95, %97, %cst_60 {dimension_numbers = #tpu.dot_dimension_numbers<[1], [0], [0], [1], [0, 0, 1, 1], [], []>} : vector<8x32xbf16>, vector<32x64xbf16>, vector<8x64xf32> -> vector<8x64xf32>
      %c0_61 = arith.constant 0 : index
      %c0_62 = arith.constant 0 : index
      %c0_63 = arith.constant 0 : index
      %99 = vector.load %arg9[%c0_61, %c0_62, %c0_63] : memref<1x1x64xf32, #tpu.memory_space<vmem>>, vector<1x1x64xf32>
      %100 = vector.shape_cast %99 : vector<1x1x64xf32> to vector<1x64xf32>
      %101 = vector.broadcast %100 : vector<1x64xf32> to vector<8x64xf32>
      %102 = arith.addf %98, %101 : vector<8x64xf32>
      %c8_i32_64 = arith.constant 8 : i32
      %103 = tpu.dynamic_rotate %102 by %c8_i32_64 dim 1 : vector<8x64xf32>, i32 -> vector<8x64xf32>
      %c56_i32_65 = arith.constant 56 : i32
      %104 = tpu.dynamic_rotate %102 by %c56_i32_65 dim 1 : vector<8x64xf32>, i32 -> vector<8x64xf32>
      %105 = tpu.iota {dimensions = array<i32: 1>} : vector<8x64xi32>
      %c16_i32_66 = arith.constant 16 : i32
      %c0_i32_67 = arith.constant 0 : i32
      %106 = arith.cmpi eq, %c16_i32_66, %c0_i32_67 : i32
      %c1_i32_68 = arith.constant 1 : i32
      %107 = arith.select %106, %c1_i32_68, %c16_i32_66 : i32
      %108 = vector.broadcast %107 : i32 to vector<8x64xi32>
      %109 = arith.remsi %105, %108 : vector<8x64xi32>
      %c0_i32_69 = arith.constant 0 : i32
      %110 = vector.broadcast %c0_i32_69 : i32 to vector<8x64xi32>
      %111 = arith.cmpi ne, %109, %110 : vector<8x64xi32>
      %c0_i32_70 = arith.constant 0 : i32
      %112 = vector.broadcast %c0_i32_70 : i32 to vector<8x64xi32>
      %113 = arith.cmpi slt, %109, %112 : vector<8x64xi32>
      %c0_i32_71 = arith.constant 0 : i32
      %114 = arith.cmpi slt, %107, %c0_i32_71 : i32
      %115 = vector.broadcast %114 : i1 to vector<8x64xi1>
      %116 = vector.broadcast %115 : vector<8x64xi1> to vector<8x64xi1>
      %117 = arith.xori %113, %116 : vector<8x64xi1>
      %118 = arith.andi %117, %111 : vector<8x64xi1>
      %119 = vector.broadcast %107 : i32 to vector<8x64xi32>
      %120 = arith.addi %109, %119 : vector<8x64xi32>
      %121 = arith.select %118, %120, %109 : vector<8x64xi1>, vector<8x64xi32>
      %c8_i32_72 = arith.constant 8 : i32
      %122 = vector.broadcast %c8_i32_72 : i32 to vector<8x64xi32>
      %123 = arith.cmpi slt, %121, %122 : vector<8x64xi32>
      %124 = arith.select %123, %104, %103 : vector<8x64xi1>, vector<8x64xf32>
      %125 = arith.mulf %102, %92 : vector<8x64xf32>
      %126 = arith.mulf %124, %93 : vector<8x64xf32>
      %127 = arith.addf %125, %126 : vector<8x64xf32>
      %c0_73 = arith.constant 0 : index
      %c0_74 = arith.constant 0 : index
      %c0_75 = arith.constant 0 : index
      %128 = vector.load %arg4[%c0_73, %c0_74, %c0_75] : memref<1x8x1xf32, #tpu.memory_space<vmem>>, vector<1x8x1xf32>
      %129 = vector.shape_cast %128 : vector<1x8x1xf32> to vector<8x1xf32>
      %130 = vector.broadcast %129 : vector<8x1xf32> to vector<8x64xf32>
      %131 = arith.mulf %127, %130 : vector<8x64xf32>
      %132 = arith.truncf %131 : vector<8x64xf32> to vector<8x64xbf16>
      %133 = vector.extract_strided_slice %132 {offsets = [0, 0], sizes = [8, 16], strides = [1, 1]} : vector<8x64xbf16> to vector<8x16xbf16>
      %c0_76 = arith.constant 0 : index
      %c0_77 = arith.constant 0 : index
      %c0_78 = arith.constant 0 : index
      %134 = vector.load %arg13[%c0_76, %c0_77, %c0_78] : memref<4x8x16xbf16, #tpu.memory_space<vmem>>, vector<1x8x16xbf16>
      %135 = vector.shape_cast %134 : vector<1x8x16xbf16> to vector<8x16xbf16>
      %136 = vector.shape_cast %133 : vector<8x16xbf16> to vector<1x8x16xbf16>
      tpu.vector_store %arg13[%c0_76, %c0_77, %c0_78], %136 {strides = array<i32>} : memref<4x8x16xbf16, #tpu.memory_space<vmem>>, vector<1x8x16xbf16>,
      %137 = vector.extract_strided_slice %132 {offsets = [0, 16], sizes = [8, 16], strides = [1, 1]} : vector<8x64xbf16> to vector<8x16xbf16>
      %c1_79 = arith.constant 1 : index
      %c0_80 = arith.constant 0 : index
      %c0_81 = arith.constant 0 : index
      %138 = vector.load %arg13[%c1_79, %c0_80, %c0_81] : memref<4x8x16xbf16, #tpu.memory_space<vmem>>, vector<1x8x16xbf16>
      %139 = vector.shape_cast %138 : vector<1x8x16xbf16> to vector<8x16xbf16>
      %140 = vector.shape_cast %137 : vector<8x16xbf16> to vector<1x8x16xbf16>
      tpu.vector_store %arg13[%c1_79, %c0_80, %c0_81], %140 {strides = array<i32>} : memref<4x8x16xbf16, #tpu.memory_space<vmem>>, vector<1x8x16xbf16>,
      %141 = vector.extract_strided_slice %132 {offsets = [0, 32], sizes = [8, 16], strides = [1, 1]} : vector<8x64xbf16> to vector<8x16xbf16>
      %c2_82 = arith.constant 2 : index
      %c0_83 = arith.constant 0 : index
      %c0_84 = arith.constant 0 : index
      %142 = vector.load %arg13[%c2_82, %c0_83, %c0_84] : memref<4x8x16xbf16, #tpu.memory_space<vmem>>, vector<1x8x16xbf16>
      %143 = vector.shape_cast %142 : vector<1x8x16xbf16> to vector<8x16xbf16>
      %144 = vector.shape_cast %141 : vector<8x16xbf16> to vector<1x8x16xbf16>
      tpu.vector_store %arg13[%c2_82, %c0_83, %c0_84], %144 {strides = array<i32>} : memref<4x8x16xbf16, #tpu.memory_space<vmem>>, vector<1x8x16xbf16>,
      %145 = vector.extract_strided_slice %132 {offsets = [0, 48], sizes = [8, 16], strides = [1, 1]} : vector<8x64xbf16> to vector<8x16xbf16>
      %c3_85 = arith.constant 3 : index
      %c0_86 = arith.constant 0 : index
      %c0_87 = arith.constant 0 : index
      %146 = vector.load %arg13[%c3_85, %c0_86, %c0_87] : memref<4x8x16xbf16, #tpu.memory_space<vmem>>, vector<1x8x16xbf16>
      %147 = vector.shape_cast %146 : vector<1x8x16xbf16> to vector<8x16xbf16>
      %148 = vector.shape_cast %145 : vector<8x16xbf16> to vector<1x8x16xbf16>
      tpu.vector_store %arg13[%c3_85, %c0_86, %c0_87], %148 {strides = array<i32>} : memref<4x8x16xbf16, #tpu.memory_space<vmem>>, vector<1x8x16xbf16>,
    } else {
    }
    %c8_i32 = arith.constant 8 : i32
    %3 = arith.muli %arg2, %c8_i32 : i32
    %4 = tpu.assume_multiple %3, 8 : i32
    %c0 = arith.constant 0 : index
    %5 = arith.index_cast %4 : i32 to index
    %c0_1 = arith.constant 0 : index
    %6 = vector.load %arg3[%c0, %5, %c0_1] : memref<1x8x32xbf16, #tpu.memory_space<vmem>>, vector<1x8x32xbf16>
    %7 = vector.shape_cast %6 : vector<1x8x32xbf16> to vector<8x32xbf16>
    %c0_2 = arith.constant 0 : index
    %c0_3 = arith.constant 0 : index
    %c0_4 = arith.constant 0 : index
    %8 = vector.load %arg6[%c0_2, %c0_3, %c0_4] : memref<1x32x64xbf16, #tpu.memory_space<vmem>>, vector<1x32x64xbf16>
    %9 = vector.shape_cast %8 : vector<1x32x64xbf16> to vector<32x64xbf16>
    %cst = arith.constant dense<0.000000e+00> : vector<8x64xf32>
    %10 = tpu.matmul %7, %9, %cst {dimension_numbers = #tpu.dot_dimension_numbers<[1], [0], [0], [1], [0, 0, 1, 1], [], []>} : vector<8x32xbf16>, vector<32x64xbf16>, vector<8x64xf32> -> vector<8x64xf32>
    %c0_5 = arith.constant 0 : index
    %c0_6 = arith.constant 0 : index
    %c0_7 = arith.constant 0 : index
    %11 = vector.load %arg8[%c0_5, %c0_6, %c0_7] : memref<1x1x64xf32, #tpu.memory_space<vmem>>, vector<1x1x64xf32>
    %12 = vector.shape_cast %11 : vector<1x1x64xf32> to vector<1x64xf32>
    %13 = vector.broadcast %12 : vector<1x64xf32> to vector<8x64xf32>
    %14 = arith.addf %10, %13 : vector<8x64xf32>
    %15 = arith.index_cast %4 : i32 to index
    %c0_8 = arith.constant 0 : index
    %16 = vector.load %arg10[%15, %c0_8] : memref<8x64xf32, #tpu.memory_space<vmem>>, vector<8x64xf32>
    %17 = arith.index_cast %4 : i32 to index
    %c0_9 = arith.constant 0 : index
    %18 = vector.load %arg11[%17, %c0_9] : memref<8x64xf32, #tpu.memory_space<vmem>>, vector<8x64xf32>
    %c8_i32_10 = arith.constant 8 : i32
    %19 = tpu.dynamic_rotate %14 by %c8_i32_10 dim 1 : vector<8x64xf32>, i32 -> vector<8x64xf32>
    %c56_i32 = arith.constant 56 : i32
    %20 = tpu.dynamic_rotate %14 by %c56_i32 dim 1 : vector<8x64xf32>, i32 -> vector<8x64xf32>
    %21 = tpu.iota {dimensions = array<i32: 1>} : vector<8x64xi32>
    %c16_i32 = arith.constant 16 : i32
    %c0_i32_11 = arith.constant 0 : i32
    %22 = arith.cmpi eq, %c16_i32, %c0_i32_11 : i32
    %c1_i32 = arith.constant 1 : i32
    %23 = arith.select %22, %c1_i32, %c16_i32 : i32
    %24 = vector.broadcast %23 : i32 to vector<8x64xi32>
    %25 = arith.remsi %21, %24 : vector<8x64xi32>
    %c0_i32_12 = arith.constant 0 : i32
    %26 = vector.broadcast %c0_i32_12 : i32 to vector<8x64xi32>
    %27 = arith.cmpi ne, %25, %26 : vector<8x64xi32>
    %c0_i32_13 = arith.constant 0 : i32
    %28 = vector.broadcast %c0_i32_13 : i32 to vector<8x64xi32>
    %29 = arith.cmpi slt, %25, %28 : vector<8x64xi32>
    %c0_i32_14 = arith.constant 0 : i32
    %30 = arith.cmpi slt, %23, %c0_i32_14 : i32
    %31 = vector.broadcast %30 : i1 to vector<8x64xi1>
    %32 = vector.broadcast %31 : vector<8x64xi1> to vector<8x64xi1>
    %33 = arith.xori %29, %32 : vector<8x64xi1>
    %34 = arith.andi %33, %27 : vector<8x64xi1>
    %35 = vector.broadcast %23 : i32 to vector<8x64xi32>
    %36 = arith.addi %25, %35 : vector<8x64xi32>
    %37 = arith.select %34, %36, %25 : vector<8x64xi1>, vector<8x64xi32>
    %c8_i32_15 = arith.constant 8 : i32
    %38 = vector.broadcast %c8_i32_15 : i32 to vector<8x64xi32>
    %39 = arith.cmpi slt, %37, %38 : vector<8x64xi32>
    %40 = arith.select %39, %20, %19 : vector<8x64xi1>, vector<8x64xf32>
    %41 = arith.mulf %14, %16 : vector<8x64xf32>
    %42 = arith.mulf %40, %18 : vector<8x64xf32>
    %43 = arith.addf %41, %42 : vector<8x64xf32>
    %44 = arith.truncf %43 : vector<8x64xf32> to vector<8x64xbf16>
    %45 = tpu.iota {dimensions = array<i32: 0>} : vector<8x8xi32>
    %46 = vector.broadcast %4 : i32 to vector<8x8xi32>
    %47 = arith.addi %46, %45 : vector<8x8xi32>
    %48 = tpu.iota {dimensions = array<i32: 1>} : vector<8x8xi32>
    %49 = arith.cmpi slt, %48, %47 : vector<8x8xi32>
    %50 = arith.extui %49 : vector<8x8xi1> to vector<8x8xi32>
    %51 = arith.sitofp %50 : vector<8x8xi32> to vector<8x8xf32>
    %c0_16 = arith.constant 0 : index
    %c0_17 = arith.constant 0 : index
    %c0_18 = arith.constant 0 : index
    %52 = vector.load %arg5[%c0_16, %c0_17, %c0_18] : memref<1x1x8xf32, #tpu.memory_space<vmem>>, vector<1x1x8xf32>
    %53 = vector.shape_cast %52 : vector<1x1x8xf32> to vector<1x8xf32>
    %cst_19 = arith.constant 1.000000e+00 : f32
    %54 = vector.broadcast %cst_19 : f32 to vector<1x8xf32>
    %55 = arith.subf %53, %54 : vector<1x8xf32>
    %56 = vector.broadcast %55 : vector<1x8xf32> to vector<8x8xf32>
    %57 = arith.subf %56, %51 : vector<8x8xf32>
    %cst_20 = arith.constant 2.500000e+11 : f32
    %58 = vector.broadcast %cst_20 : f32 to vector<8x8xf32>
    %59 = arith.mulf %57, %58 : vector<8x8xf32>
    %60 = vector.extract_strided_slice %44 {offsets = [0, 0], sizes = [8, 16], strides = [1, 1]} : vector<8x64xbf16> to vector<8x16xbf16>
    %c0_21 = arith.constant 0 : index
    %c0_22 = arith.constant 0 : index
    %c0_23 = arith.constant 0 : index
    %61 = vector.load %arg13[%c0_21, %c0_22, %c0_23] : memref<4x8x16xbf16, #tpu.memory_space<vmem>>, vector<1x8x16xbf16>
    %62 = vector.shape_cast %61 : vector<1x8x16xbf16> to vector<8x16xbf16>
    %cst_24 = arith.constant dense<0.000000e+00> : vector<8x8xf32>
    %63 = tpu.matmul %60, %62, %cst_24 {dimension_numbers = #tpu.dot_dimension_numbers<[1], [1], [0], [0], [0, 0, 1, 0], [], []>} : vector<8x16xbf16>, vector<8x16xbf16>, vector<8x8xf32> -> vector<8x8xf32>
    %64 = arith.addf %63, %59 : vector<8x8xf32>
    %c0_25 = arith.constant 0 : index
    %c0_26 = arith.constant 0 : index
    %c0_27 = arith.constant 0 : index
    %c0_28 = arith.constant 0 : index
    %65 = vector.load %arg12[%c0_25, %c0_26, %c0_27, %c0_28] : memref<1x4x8x8xf32, #tpu.memory_space<vmem>>, vector<1x1x8x8xf32>
    %66 = vector.shape_cast %65 : vector<1x1x8x8xf32> to vector<8x8xf32>
    %67 = vector.shape_cast %64 : vector<8x8xf32> to vector<1x1x8x8xf32>
    tpu.vector_store %arg12[%c0_25, %c0_26, %c0_27, %c0_28], %67 {strides = array<i32>} : memref<1x4x8x8xf32, #tpu.memory_space<vmem>>, vector<1x1x8x8xf32>,
    %68 = vector.extract_strided_slice %44 {offsets = [0, 16], sizes = [8, 16], strides = [1, 1]} : vector<8x64xbf16> to vector<8x16xbf16>
    %c1 = arith.constant 1 : index
    %c0_29 = arith.constant 0 : index
    %c0_30 = arith.constant 0 : index
    %69 = vector.load %arg13[%c1, %c0_29, %c0_30] : memref<4x8x16xbf16, #tpu.memory_space<vmem>>, vector<1x8x16xbf16>
    %70 = vector.shape_cast %69 : vector<1x8x16xbf16> to vector<8x16xbf16>
    %cst_31 = arith.constant dense<0.000000e+00> : vector<8x8xf32>
    %71 = tpu.matmul %68, %70, %cst_31 {dimension_numbers = #tpu.dot_dimension_numbers<[1], [1], [0], [0], [0, 0, 1, 0], [], []>} : vector<8x16xbf16>, vector<8x16xbf16>, vector<8x8xf32> -> vector<8x8xf32>
    %72 = arith.addf %71, %59 : vector<8x8xf32>
    %c0_32 = arith.constant 0 : index
    %c1_33 = arith.constant 1 : index
    %c0_34 = arith.constant 0 : index
    %c0_35 = arith.constant 0 : index
    %73 = vector.load %arg12[%c0_32, %c1_33, %c0_34, %c0_35] : memref<1x4x8x8xf32, #tpu.memory_space<vmem>>, vector<1x1x8x8xf32>
    %74 = vector.shape_cast %73 : vector<1x1x8x8xf32> to vector<8x8xf32>
    %75 = vector.shape_cast %72 : vector<8x8xf32> to vector<1x1x8x8xf32>
    tpu.vector_store %arg12[%c0_32, %c1_33, %c0_34, %c0_35], %75 {strides = array<i32>} : memref<1x4x8x8xf32, #tpu.memory_space<vmem>>, vector<1x1x8x8xf32>,
    %76 = vector.extract_strided_slice %44 {offsets = [0, 32], sizes = [8, 16], strides = [1, 1]} : vector<8x64xbf16> to vector<8x16xbf16>
    %c2 = arith.constant 2 : index
    %c0_36 = arith.constant 0 : index
    %c0_37 = arith.constant 0 : index
    %77 = vector.load %arg13[%c2, %c0_36, %c0_37] : memref<4x8x16xbf16, #tpu.memory_space<vmem>>, vector<1x8x16xbf16>
    %78 = vector.shape_cast %77 : vector<1x8x16xbf16> to vector<8x16xbf16>
    %cst_38 = arith.constant dense<0.000000e+00> : vector<8x8xf32>
    %79 = tpu.matmul %76, %78, %cst_38 {dimension_numbers = #tpu.dot_dimension_numbers<[1], [1], [0], [0], [0, 0, 1, 0], [], []>} : vector<8x16xbf16>, vector<8x16xbf16>, vector<8x8xf32> -> vector<8x8xf32>
    %80 = arith.addf %79, %59 : vector<8x8xf32>
    %c0_39 = arith.constant 0 : index
    %c2_40 = arith.constant 2 : index
    %c0_41 = arith.constant 0 : index
    %c0_42 = arith.constant 0 : index
    %81 = vector.load %arg12[%c0_39, %c2_40, %c0_41, %c0_42] : memref<1x4x8x8xf32, #tpu.memory_space<vmem>>, vector<1x1x8x8xf32>
    %82 = vector.shape_cast %81 : vector<1x1x8x8xf32> to vector<8x8xf32>
    %83 = vector.shape_cast %80 : vector<8x8xf32> to vector<1x1x8x8xf32>
    tpu.vector_store %arg12[%c0_39, %c2_40, %c0_41, %c0_42], %83 {strides = array<i32>} : memref<1x4x8x8xf32, #tpu.memory_space<vmem>>, vector<1x1x8x8xf32>,
    %84 = vector.extract_strided_slice %44 {offsets = [0, 48], sizes = [8, 16], strides = [1, 1]} : vector<8x64xbf16> to vector<8x16xbf16>
    %c3 = arith.constant 3 : index
    %c0_43 = arith.constant 0 : index
    %c0_44 = arith.constant 0 : index
    %85 = vector.load %arg13[%c3, %c0_43, %c0_44] : memref<4x8x16xbf16, #tpu.memory_space<vmem>>, vector<1x8x16xbf16>
    %86 = vector.shape_cast %85 : vector<1x8x16xbf16> to vector<8x16xbf16>
    %cst_45 = arith.constant dense<0.000000e+00> : vector<8x8xf32>
    %87 = tpu.matmul %84, %86, %cst_45 {dimension_numbers = #tpu.dot_dimension_numbers<[1], [1], [0], [0], [0, 0, 1, 0], [], []>} : vector<8x16xbf16>, vector<8x16xbf16>, vector<8x8xf32> -> vector<8x8xf32>
    %88 = arith.addf %87, %59 : vector<8x8xf32>
    %c0_46 = arith.constant 0 : index
    %c3_47 = arith.constant 3 : index
    %c0_48 = arith.constant 0 : index
    %c0_49 = arith.constant 0 : index
    %89 = vector.load %arg12[%c0_46, %c3_47, %c0_48, %c0_49] : memref<1x4x8x8xf32, #tpu.memory_space<vmem>>, vector<1x1x8x8xf32>
    %90 = vector.shape_cast %89 : vector<1x1x8x8xf32> to vector<8x8xf32>
    %91 = vector.shape_cast %88 : vector<8x8xf32> to vector<1x1x8x8xf32>
    tpu.vector_store %arg12[%c0_46, %c3_47, %c0_48, %c0_49], %91 {strides = array<i32>} : memref<1x4x8x8xf32, #tpu.memory_space<vmem>>, vector<1x1x8x8xf32>,
    return
  }
  func.func @transform_0(%arg0: i32, %arg1: i32, %arg2: i32) -> (i32, i32, i32) {
    %c0_i32 = arith.constant 0 : i32
    %c0_i32_0 = arith.constant 0 : i32
    %c0_i32_1 = arith.constant 0 : i32
    return %arg0, %c0_i32, %c0_i32_0 : i32, i32, i32
  }
  func.func @transform_1(%arg0: i32, %arg1: i32, %arg2: i32) -> (i32, i32, i32) {
    %c0_i32 = arith.constant 0 : i32
    %c0_i32_0 = arith.constant 0 : i32
    %c0_i32_1 = arith.constant 0 : i32
    return %arg0, %c0_i32, %c0_i32_0 : i32, i32, i32
  }
  func.func @transform_2(%arg0: i32, %arg1: i32, %arg2: i32) -> (i32, i32, i32) {
    %c0_i32 = arith.constant 0 : i32
    %c0_i32_0 = arith.constant 0 : i32
    %c0_i32_1 = arith.constant 0 : i32
    return %arg0, %c0_i32, %c0_i32_0 : i32, i32, i32
  }
  func.func @transform_3(%arg0: i32, %arg1: i32, %arg2: i32) -> (i32, i32, i32) {
    %c0_i32 = arith.constant 0 : i32
    %c0_i32_0 = arith.constant 0 : i32
    %c0_i32_1 = arith.constant 0 : i32
    return %arg1, %c0_i32, %c0_i32_0 : i32, i32, i32
  }
  func.func @transform_4(%arg0: i32, %arg1: i32, %arg2: i32) -> (i32, i32, i32) {
    %c0_i32 = arith.constant 0 : i32
    %c0_i32_0 = arith.constant 0 : i32
    %c0_i32_1 = arith.constant 0 : i32
    return %arg1, %c0_i32, %c0_i32_0 : i32, i32, i32
  }
  func.func @transform_5(%arg0: i32, %arg1: i32, %arg2: i32) -> (i32, i32, i32) {
    %c0_i32 = arith.constant 0 : i32
    %c0_i32_0 = arith.constant 0 : i32
    %c0_i32_1 = arith.constant 0 : i32
    return %arg1, %c0_i32, %c0_i32_0 : i32, i32, i32
  }
  func.func @transform_6(%arg0: i32, %arg1: i32, %arg2: i32) -> (i32, i32, i32) {
    %c0_i32 = arith.constant 0 : i32
    %c0_i32_0 = arith.constant 0 : i32
    %c0_i32_1 = arith.constant 0 : i32
    return %arg1, %c0_i32, %c0_i32_0 : i32, i32, i32
  }
  func.func @transform_7(%arg0: i32, %arg1: i32, %arg2: i32) -> (i32, i32) {
    %c0_i32 = arith.constant 0 : i32
    %c0_i32_0 = arith.constant 0 : i32
    %c0_i32_1 = arith.constant 0 : i32
    return %c0_i32, %c0_i32_0 : i32, i32
  }
  func.func @transform_8(%arg0: i32, %arg1: i32, %arg2: i32) -> (i32, i32) {
    %c0_i32 = arith.constant 0 : i32
    %c0_i32_0 = arith.constant 0 : i32
    %c0_i32_1 = arith.constant 0 : i32
    return %c0_i32, %c0_i32_0 : i32, i32
  }
  func.func @transform_9(%arg0: i32, %arg1: i32, %arg2: i32) -> (i32, i32, i32, i32) {
    %c0_i32 = arith.constant 0 : i32
    %c0_i32_0 = arith.constant 0 : i32
    return %arg0, %arg1, %arg2, %c0_i32 : i32, i32, i32, i32
  }
}

</mosaic_0001>

<bundles_post_ra>
// kernel: tpu_custom_call.1
= control target key start
LH: loop header
LB: loop body
LE: loop exit
PB: predicated region body
PF: predicated region fallthrough
CT: control target
= control target key end

     0   :  { %s2004_s0 = inlined_call_operand.hbm [shape: bf16[2,8,32], index: 0, kind: input, shape index: {}]   ;;  %s2005_s1 = inlined_call_operand.vmem [shape: f32[2,8,1], index: 1, kind: input, shape index: {}]   ;;  %s2006_s2 = inlined_call_operand.hbm [shape: f32[2,1,8], index: 2, kind: input, shape index: {}]   ;;  %s2007_s3 = inlined_call_operand.vmem [shape: bf16[1,32,64], index: 3, kind: input, shape index: {}]   ;;  %s2008_s4 = inlined_call_operand.vmem [shape: bf16[1,32,64], index: 4, kind: input, shape index: {}]   ;;  %s2009_s5 = inlined_call_operand.hbm [shape: f32[1,1,64], index: 5, kind: input, shape index: {}]   ;;  %s2010_s6 = inlined_call_operand.hbm [shape: f32[1,1,64], index: 6, kind: input, shape index: {}]   ;;  %s2011_s7 = inlined_call_operand.vmem [shape: f32[8,64], index: 7, kind: input, shape index: {}]   ;;  %s2012_s8 = inlined_call_operand.vmem [shape: f32[8,64], index: 8, kind: input, shape index: {}]   ;;  %s2013_s9 = inlined_call_operand.hbm [shape: f32[2,4,8,8], index: 9, kind: output, shape index: {}]  }
   0x1   :  { %2020 = sst [smem:[#allocation20_spill]] %s2004_s0 }
   0x2   :  { %2021 = sst [smem:[#allocation21_spill]] %s2009_s5 }
   0x3   :  { %2022 = sst [smem:[#allocation22_spill]] %s2010_s6 }
   0x4   :  { %14 = vsyncpa [#allocation4], 0 }
   0x5   :  { %16 = vsyncpa [#allocation4 + $0x1], 0 }
   0x6   :  { %17 = vsyncpa [#allocation7], 0 }
   0x7   :  { %19 = vsyncpa [#allocation7 + $0x1], 0 }
   0x8   :  { %20 = vsyncpa [#allocation10], 0 }
   0x9   :  { %21 = vsyncpa [#allocation5], 0 }
   0xa   :  { %23 = vsyncpa [#allocation5 + $0x1], 0  ;;  %s1647_s30 = smov 0   ;;  %s1649_s10 = smov 0  }
   0xb   :  { %s1651_s11 = smov 0   ;;  %s1653_s12 = smov 0  }
   0xc   :  { %s1655_s13 = smov 0   ;;  %s1657_s14 = smov 0  }
   0xd LB: > { %s1678_s15 = sadd.s32 4294967295, %s1579_s14   ;;  %s1170_s16 = sadd.s32 4294967294, %s1579_s14   ;;  %s1579_s14 = sphi %s1657_s14, %s29_s14   ;;  %s1575_s13 = sphi %s1655_s13, %s2053_s13   ;;  %s1571_s12 = sphi %s1653_s12, %s2052_s12   ;;  %s1567_s11 = sphi %s1651_s11, %s2051_s11   ;;  %s1563_s10 = sphi %s1649_s10, %s2050_s10   ;;  %s1559_s30 = sphi %s1647_s30, %s2049_s30  }
   0xe   : > { %p68_p0 = scmp.ne.s32.totalorder %s1563_s10, %s1559_s30  ;;  %p2014_p1 = scmp.eq.s32.totalorder %s1678_s15, 0 }
   0xf   : > { %p300_p3 = scmp.eq.s32.totalorder %s1170_s16, 1  ;;  %p1171_p5 = scmp.ge.s32.totalorder %s1579_s14, 1 }
  0x10   : > { %p1687_p4 = por %p2014_p1, %p68_p0  ;;  %p307_p7 = scmp.lt.s32.totalorder %s1579_s14, 3 }
  0x11   : > { %p1692_p6 = por %p300_p3, %p68_p0  ;;  %s1581_s20 = smov [#allocation8]  }
  0x12   : > { %s2023_s17 = scalar_select %p1687_p4, 1, 0 }
  0x13   : > { %s2024_s18 = scalar_select %p1692_p6, 1, 0 }
  0x14   : > { %p1697_p8 = pnand %p1171_p5, %p307_p7  ;;  %s338_s21 = sshll.u32 %s1581_s20, 4  ;;  %s339_s21 = int_to_ptr.vmem [resolvable:$true] %s338_s21 }
  0x15   : > { %2025 = sst [smem:[#allocation17_spill]] %s2024_s18  ;;  %s1582_s22 = smov [#allocation9]  }
  0x16   : > { %s2026_s19 = scalar_select %p1697_p8, 1, 0 }
  0x17   : > { %p1279_p10 = pneg %p1697_p8  ;;  %s351_s23 = sshll.u32 %s1582_s22, 4  ;;  %s1710_s23 = int_to_ptr.vmem [resolvable:$true] %s351_s23 }
  0x18   : > { %s2028_s5 = sld [smem:[#allocation21_spill]] }
  0x19   : > { %p1706_p11 = pnand %p1279_p10, %p2014_p1 }
  0x1b   : > { %p1371_p13 = pneg %p1706_p11 }
  0x1e   : > { %s1369_s27 = scalar_lea.hbm %s2028_s5, 16 }
  0x1f   : > { %p1370_p12 = scmp.ne.s32.totalorder %s2028_s5, %s1369_s27  ;;  %p1376_p5 = scmp.lt.u32.totalorder %s1369_s27, %s2028_s5 }
  0x21   : > { %p1372_p0 = pnand %p1371_p13, %p1370_p12 }
  0x23   : > { %p1373_p3 = pneg %p1372_p0 }
  0x25   : > { %p1378_p7 = pnand %p1376_p5, %p1373_p3 }
  0x27   : > { %1381 = shalt.err (!%p1378_p7)
}
  0x28   : > { %s1382_s22 = scalar_lea.vmem %s339_s21, 16  ;;  %s1389_s25 = scalar_lea.vmem %s339_s21, 32 }
  0x29   : > { %p1383_p10 = scmp.ne.s32.totalorder %s339_s21, %s1382_s22  ;;  %p1390_p2 = scmp.lt.s32.totalorder %s339_s21, %s339_s21 }
  0x2a   : > { %p1391_p6 = scmp.lt.s32.totalorder %s1389_s25, %s1382_s22 }
  0x2b   : > { %p1385_p9 = pnand %p1383_p10, %p1371_p13 }
  0x2c   : > { %p1392_p4 = por %p1391_p6, %p1390_p2 }
  0x2d   : > { %p1386_p1 = pneg %p1385_p9 }
  0x2f   : > { %p1393_p8 = pnand %p1392_p4, %p1386_p1 }
  0x31   : > { %1396 = shalt.err (!%p1393_p8)
}
  0x32   : > { %1282 = dma.hbm_to_vmem [thread:$0]  (!%p1706_p11), %s2028_s5, 16, %s339_s21, [#allocation7]  }
  0x33   : > { %s2029_s6 = sld [smem:[#allocation22_spill]] }
  0x39   : > { %s1397_s16 = scalar_lea.hbm %s2029_s6, 16 }
  0x3a   : > { %p1398_p9 = scmp.ne.s32.totalorder %s2029_s6, %s1397_s16  ;;  %p1404_p4 = scmp.lt.u32.totalorder %s1397_s16, %s2029_s6 }
  0x3c   : > { %p1400_p2 = pnand %p1398_p9, %p1371_p13 }
  0x3e   : > { %p1401_p1 = pneg %p1400_p2 }
  0x40   : > { %p1406_p6 = pnand %p1404_p4, %p1401_p1 }
  0x42   : > { %1409 = shalt.err (!%p1406_p6)
}
  0x43   : > { %s1410_s21 = scalar_lea.vmem %s1710_s23, 16  ;;  %s1417_s18 = scalar_lea.vmem %s1710_s23, 32 }
  0x44   : > { %p1411_p8 = scmp.ne.s32.totalorder %s1710_s23, %s1410_s21  ;;  %p1418_p3 = scmp.lt.s32.totalorder %s1710_s23, %s1710_s23 }
  0x45   : > { %p1419_p5 = scmp.lt.s32.totalorder %s1417_s18, %s1410_s21 }
  0x46   : > { %p1413_p12 = pnand %p1411_p8, %p1371_p13 }
  0x47   : > { %p1420_p7 = por %p1419_p5, %p1418_p3 }
  0x48   : > { %p1414_p0 = pneg %p1413_p12 }
  0x4a   : > { %p1421_p10 = pnand %p1420_p7, %p1414_p0 }
  0x4c   : > { %1424 = shalt.err (!%p1421_p10)
}
  0x4d   : > { %1285 = dma.hbm_to_vmem [thread:$0]  (!%p1706_p11), %s2029_s6, 16, %s1710_s23, [#allocation10]  }
  0x4e   : > { %s48_s27 = sadd.s32 1, %s1575_s13  ;;  %s55_s29 = sadd.s32 1, %s1567_s11 }
  0x4f   : > { %p50_p13 = scmp.ge.s32.totalorder %s48_s27, 2  ;;  %p62_p9 = scmp.ne.s32.totalorder %s1567_s11, %s1563_s10 }
  0x50   : > { %p63_p2 = scmp.eq.s32.totalorder %s1579_s14, 0  ;;  %p1299_p1 = scmp.lt.s32.totalorder %s1579_s14, 2 }
  0x51   : > { %s2055_s27 = smov (%p50_p13, %s48_s27), 0  ;;  %p2031_p6 = scmp.eq.s32.totalorder %s1678_s15, 1 }
  0x52   : > { %2030 = sst [smem:[#allocation18_spill]] %s2055_s27  ;;  %p64_p4 = por %p63_p2, %p62_p9 }
  0x53   : > { %p1770_p8 = por %p2031_p6, %p62_p9  ;;  %s52_s16 = ssub.s32 %s1575_s13, %s2055_s27 }
  0x54   : > { %s1777_s20 = sand.u32 1, %s1567_s11   ;;  %p53_p11 = scmp.eq.s32.totalorder %s52_s16, 0 }
  0x55   : > { %s2032_s24 = scalar_select %p1770_p8, 1, 0 }
  0x56   : > { %s1177_s23 = sshll.u32 %s1777_s20, 2  ;;  %s1178_s22 = sshll.u32 %s1575_s13, 6 }
  0x57   : > { %s1782_s25 = scalar_select %p53_p11, %s1567_s11, %s55_s29  }
  0x58   : > { %s2034_s0 = sld [smem:[#allocation20_spill]]  ;;  %s372_s28 = scalar_lea.vmem [#allocation3], %s1177_s23 }
  0x59   : > { %2033 = sst [smem:[#allocation19_spill]] %s1782_s25  ;;  %s379_s5 = sshll.u32 %s372_s28, 4  ;;  %s1795_s5 = int_to_ptr.vmem [resolvable:$true] %s379_s5 }
  0x5a   : > { %p1791_p12 = pnand %p1299_p1, %p64_p4  ;;  %s369_s16 = scalar_lea.sflag [#allocation4], %s1777_s20 }
  0x5c   : > { %p1427_p3 = pneg %p1791_p12 }
  0x5e   : > { %s1787_s26 = scalar_lea.hbm %s2034_s0, %s1178_s22  ;;  %s1430_s18 = scalar_lea.hbm %s2034_s0, 128 }
  0x5f   : > { %s1425_s21 = scalar_lea.hbm %s1787_s26, 64  ;;  %p1431_p10 = scmp.lt.u32.totalorder %s1787_s26, %s2034_s0 }
  0x60   : > { %p1426_p0 = scmp.ne.s32.totalorder %s1787_s26, %s1425_s21  ;;  %p1432_p13 = scmp.lt.u32.totalorder %s1430_s18, %s1425_s21 }
  0x61   : > { %p1434_p2 = scmp.lt.u32.totalorder %s1425_s21, %s1787_s26 }
  0x62   : > { %p1428_p5 = pnand %p1427_p3, %p1426_p0  ;;  %p1433_p9 = por %p1432_p13, %p1431_p10 }
  0x64   : > { %p1429_p7 = pneg %p1428_p5  ;;  %p1435_p1 = por %p1434_p2, %p1433_p9 }
  0x66   : > { %p1436_p4 = pnand %p1435_p1, %p1429_p7 }
  0x68   : > { %1439 = shalt.err (!%p1436_p4)
}
  0x69   : > { %s1440_s29 = scalar_lea.vmem %s1795_s5, 64  ;;  %s1583_s23 = smov [#allocation3]  }
  0x6a   : > { %p1441_p6 = scmp.ne.s32.totalorder %s1795_s5, %s1440_s29  ;;  %s1445_s22 = sshll.u32 %s1583_s23, 4  ;;  %s1446_s22 = int_to_ptr.vmem [resolvable:$false] %s1445_s22 }
  0x6b   : > { %s1447_s27 = scalar_lea.vmem %s1446_s22, 128  ;;  %p1448_p5 = scmp.lt.s32.totalorder %s1795_s5, %s1446_s22 }
  0x6c   : > { %p1443_p11 = pnand %p1441_p6, %p1427_p3  ;;  %p1449_p10 = scmp.lt.s32.totalorder %s1447_s27, %s1440_s29 }
  0x6e   : > { %p1444_p0 = pneg %p1443_p11  ;;  %p1450_p13 = por %p1449_p10, %p1448_p5 }
  0x70   : > { %p1451_p9 = pnand %p1450_p13, %p1444_p0 }
  0x72   : > { %1454 = shalt.err (!%p1451_p9)
}
  0x73   : > { %1289 = dma.hbm_to_vmem [thread:$0]  (!%p1791_p12), %s1787_s26, 64, %s1795_s5, %s369_s16  }
  0x74   : > { %s1179_s21 = sshll.u32 %s1575_s13, 4  ;;  %s396_s29 = scalar_lea.vmem [#allocation6], %s1777_s20 }
  0x75   : > { %s1828_s23 = scalar_lea.hbm %s2006_s2, %s1179_s21  ;;  %s403_s22 = sshll.u32 %s396_s29, 4  ;;  %s404_s22 = int_to_ptr.vmem [resolvable:$true] %s403_s22 }
  0x76   : > { %s2036_s27 = sand.u32 1, %s1579_s14   ;;  %s1455_s25 = scalar_lea.hbm %s1828_s23, 16 }
  0x77   : > { %s394_s0 = scalar_lea.sflag [#allocation7], %s2036_s27  ;;  %p1456_p7 = scmp.ne.s32.totalorder %s1828_s23, %s1455_s25 }
  0x78   : > { %s1460_s16 = scalar_lea.hbm %s2006_s2, 32  ;;  %p1461_p4 = scmp.lt.u32.totalorder %s1828_s23, %s2006_s2 }
  0x79   : > { %p1458_p2 = pnand %p1456_p7, %p1427_p3  ;;  %p1462_p6 = scmp.lt.u32.totalorder %s1460_s16, %s1455_s25 }
  0x7a   : > { %p1464_p0 = scmp.lt.u32.totalorder %s1455_s25, %s1828_s23 }
  0x7b   : > { %p1459_p1 = pneg %p1458_p2  ;;  %p1463_p11 = por %p1462_p6, %p1461_p4 }
  0x7d   : > { %p1465_p5 = por %p1464_p0, %p1463_p11 }
  0x7f   : > { %p1466_p10 = pnand %p1465_p5, %p1459_p1 }
  0x81   : > { %1469 = shalt.err (!%p1466_p10)
}
  0x82   : > { %s1470_s20 = scalar_lea.vmem %s404_s22, 16  ;;  %s1584_s28 = smov [#allocation6]  }
  0x83   : > { %p1471_p13 = scmp.ne.s32.totalorder %s404_s22, %s1470_s20  ;;  %s1475_s29 = sshll.u32 %s1584_s28, 4  ;;  %s1476_s29 = int_to_ptr.vmem [resolvable:$false] %s1475_s29 }
  0x84   : > { %s1477_s27 = scalar_lea.vmem %s1476_s29, 32  ;;  %p1478_p2 = scmp.lt.s32.totalorder %s404_s22, %s1476_s29 }
  0x85   : > { %p1473_p9 = pnand %p1471_p13, %p1427_p3  ;;  %p1479_p8 = scmp.lt.s32.totalorder %s1477_s27, %s1470_s20 }
  0x87   : > { %p1474_p7 = pneg %p1473_p9  ;;  %p1480_p4 = por %p1479_p8, %p1478_p2 }
  0x89   : > { %p1481_p6 = pnand %p1480_p4, %p1474_p7 }
  0x8b   : > { %1484 = shalt.err (!%p1481_p6)
}
  0x8c   : > { %1292 = dma.hbm_to_vmem [thread:$0]  (!%p1791_p12), %s1828_s23, 16, %s404_s22, %s394_s0  }
  0x8d   : > { %p2037_p1 = scmp.ne.s32.totalorder %s2026_s19, 0 }
  0x8e   : > { %s1855_s25 = sand.u32 (!%p2037_p1), 1, %s1563_s10   ;;  %p2038_p8 = scmp.ne.s32.totalorder (!%p2037_p1), %s2023_s17, 0 }
  0x8f   : > { %412 = sbr.rel (%p2037_p1) target bundleno = 1113 (0x459), region = 56  ;;  %s1181_s5 = sshll.u32 (!%p2037_p1), %s1855_s25, 2 }
  0x90   : > { %s415_s26 = scalar_lea.sflag (!%p2037_p1), [#allocation4], %s1855_s25  ;;  %s1859_s16 = scalar_lea.vmem (!%p2037_p1), [#allocation3], %s1181_s5 }
  0x96   : > { %1538 = dma.done.wait (%p2038_p8), %s415_s26, 64  }
  0x97   : > { %1540 = vsyncadd (%p2038_p8), %s415_s26, 4294967232  ;;  %s423_s0 = sand.u32 1, %s1678_s15   ;;  %s426_s19 = scalar_lea.vmem [#allocation6], %s1855_s25 }
  0x98   : > { %s424_s6 = scalar_lea.sflag [#allocation7], %s423_s0 }
  0x99   : > { %1542 = dma.done.wait (%p2038_p8), %s424_s6, 16  }
  0x9a   : > { %1544 = vsyncadd (%p2038_p8), %s424_s6, 4294967280  ;;  %p2039_p12 = scmp.eq.s32.totalorder %s1678_s15, 0 }
  0x9c   : > { %1546 = dma.done.wait (%p2039_p12), [#allocation7], 16   ;;  %p2040_p3 = pmov %p2039_p12 }
  0x9e   : > { %1548 = vsyncadd (%p2040_p3), [#allocation7], 4294967280  ;;  %p2041_p11 = pmov %p2040_p3 }
  0x9f   : > { %p2042_p0 = pmov %p2040_p3 }
  0xa0   : > { %1550 = dma.done.wait (%p2041_p11), [#allocation10], 16  }
  0xa1   : > { %1552 = vsyncadd (%p2042_p0), [#allocation10], 4294967280  ;;  %v1585_v0 = vmov 0.0   ;;  %vm1586_vm0 = vmmov 0   ;;  %v1365_v1 = vld [vmem:[%s2008_s4] sm:$0xff]   ;;  %v1366_v2 = vld [vmem:[%s2008_s4 + $0x8] sm:$0xff]   ;;  %v584_v25 = vlaneseq }
  0xa2   : > { %1225 = vmatprep.subr.bf16.mxu0 %v1585_v0  ;;  %1233 = vmatprep.subr.bf16.mxu1 %v1585_v0  ;;  %v1367_v3 = vld [vmem:[%s2007_s3] sm:$0xff]   ;;  %v1368_v4 = vld [vmem:[%s2007_s3 + $0x8] sm:$0xff]   ;;  %v509_v5 = vld [vmem:[%s1859_s16] sm:$0xf]  ;;  %vm533_vm1 = vcmask 261120   ;;  %p487_p5 = scmp.lt.s32.totalorder %s1571_s12, 1 }
  0xa3   : > { %1229 = vmatprep.mubr.msk.bf16.mxu0 %vm1586_vm0, %v1585_v0  ;;  %1237 = vmatprep.mubr.msk.bf16.mxu1 %vm1586_vm0, %v1585_v0  ;;  %v643_v6 = vld [vmem:[%s1859_s16] sm:$0xf]  ;;  %v1587_v7 = vmov 0   ;;  %v1186_v8 = vld [vmem:[#allocation9] ss:$0 sm:$0xff]  ;;  %s1588_s5 = smov 64  }
  0xa4   : > { %1226 = vmatpush3.bf16.msra.mxu0 %v1365_v1  ;;  %1234 = vmatpush3.bf16.msra.mxu1 %v1367_v3  ;;  %s488_s29 = scalar_select %p487_p5, %s1571_s12, 1  ;;  %v1191_v10 = vld [vmem:[#allocation8] ss:$0 sm:$0xff]  ;;  %vm577_vm2 = vcmask 1048064   ;;  %v585_v26 = vand.u32 127, %v584_v25  ;;  %v750_v27 = vshrl.u32 %v584_v25, 7 }
  0xa5   : > { %1227 = vmatprep.subr.bf16.mxu0 %v1585_v0  ;;  %1235 = vmatprep.subr.bf16.mxu1 %v1585_v0  ;;  %s1589_s6 = smov 120   ;;  %s1590_s17 = smov 72   ;;  %v507_v35 = vld [vmem:[%s2011_s7] sm:$0xff]  ;;  %vm618_vm5 = vcmask 125952   ;;  %vm767_vm6 = vcmask 130048   ;;  %vm814_vm7 = vcmask 64512  }
  0xa6   : > { %1364 = vset.pattern.permute.xlu0 %v1587_v7  ;;  %s1185_s27 = sshll.u32 %s488_s29, 3  ;;  %vm753_vm3 = vcmp.lt.s32.totalorder %v585_v26, %v750_v27  ;;  %v590_v32 = vand.u32 15, %v585_v26  ;;  %v508_v36 = vld [vmem:[%s2012_s8] sm:$0xff]  ;;  %s1591_s18 = smov 96   ;;  %v761_v53 = vsub.s32 0, %v750_v27 }
  0xa7   : > { %s490_s0 = scalar_lea.vmem %s2005_s1, %s1185_s27  ;;  %s1592_s20 = smov 112   ;;  %v756_v54 = vld [vmem:[%s426_s19] sm:$0x1]  ;;  %v1195_v56 = vsel %vm753_vm3, 1.0, %v1585_v0 }
  0xa8   : > { %1228 = vmatpush3.bf16.msra.mxu0 %v1366_v2  ;;  %1236 = vmatpush3.bf16.msra.mxu1 %v1368_v4  ;;  %v610_v20 = vld [vmem:[%s490_s0] sm:$0xff]  ;;  %vm598_vm4 = vcmp.lt.s32.totalorder %v590_v32, 8  ;;  %s1593_s28 = smov 80   ;;  %v1196_v55 = vadd.f32 -1.0, %v756_v54  ;;  %s1184_s19 = sshll.u32 %s1855_s25, 5 }
  0xa9   : > { %1241 = vmatprep.subr.bf16.mxu0 %v1585_v0  ;;  %1247 = vmatprep.subr.bf16.mxu1 %v1585_v0  ;;  %s486_s29 = scalar_lea.vmem [#allocation11], %s1184_s19  ;;  %p2043_p13 = scmp.ne.s32.totalorder %s2032_s24, 0 }
  0xaa   : > { %v762_v57 = vrot.slane %v1196_v55, %v761_v53  ;;  %s990_s27 = sshll.u32 %s486_s29, 4  ;;  %s1949_s27 = int_to_ptr.vmem [resolvable:$true] %s990_s27 }
  0xab   : > { %1230 = vmatmul.mubr.msk.bf16.vlgmr.msra.gmra.mrb[0].mxu0 %vm533_vm1, %v509_v5  ;;  %1238 = vmatmul.mubr.msk.bf16.vlgmr.msra.gmra.mrb[0].mxu1 %vm533_vm1, %v643_v6 }
  0xac   : > { %1243 = vmatprep.mubr.msk.bf16.mxu0 %vm1586_vm0, %v1585_v0  ;;  %1249 = vmatprep.mubr.msk.bf16.mxu1 %vm1586_vm0, %v1585_v0  ;;  %v764_v58 = vsub.f32 %v762_v57, %v1195_v56 }
 0x17e   : > { %v571_v9 = vpop.f32.mrb[0].mxu0  ;;  %v705_v14 = vpop.f32.mrb[0].mxu1 }
 0x17f   : > { %v572_v11 = vadd.f32 %v1186_v8, %v571_v9  ;;  %v1231_v12 = vpop.f32.mrb[1].mxu0  ;;  %v706_v16 = vadd.f32 %v1191_v10, %v705_v14  ;;  %v1239_v17 = vpop.f32.mrb[1].mxu1  ;;  %v765_v8 = vmul.f32 2.5e+11, %v764_v58 }
 0x180   : > { %v574_v13 = vpop.f32.mrb[2].mxu0  ;;  %v708_v18 = vpop.f32.mrb[2].mxu1 }
 0x181   : > { %578 = vrot.lane.b32.xlu0 %v572_v11, %s1588_s5  ;;  %v1232_v15 = vpop.f32.mrb[3].mxu0  ;;  %v1240_v19 = vpop.f32.mrb[3].mxu1  ;;  %v607_v39 = vmul.f32 %v572_v11, %v507_v35  ;;  %v745_v46 = vmul.f32 %v706_v16, %v507_v35 }
 0x185   : > { %716 = vrot.lane.b32.xlu0 %v706_v16, %s1588_s5 }
 0x189   : > { %613 = vperm.xlu0 %1364, %v610_v20  }
 0x1f3   : > { %v579_v21 = vpop.permute.xlu0 %578 }
 0x1f4   : > { %v580_v22 = vsel %vm577_vm2, %v579_v21, %v572_v11 }
 0x1f5   : > { %581 = vrot.lane.b32.xlu1 %v580_v22, %s1588_s5 }
 0x1f7   : > { %v717_v23 = vpop.permute.xlu0 %716 }
 0x1f8   : > { %v718_v24 = vsel %vm577_vm2, %v717_v23, %v706_v16 }
 0x1f9   : > { %719 = vrot.lane.b32.xlu1 %v718_v24, %s1588_s5  ;;  %s1210_s5 = sshll.u32 %s1571_s12, 9  ;;  %s1594_s12 = smov [#allocation11]  }
 0x1fa   : > { %s1954_s0 = scalar_lea.hbm %s2013_s9, %s1210_s5  ;;  %s1489_s23 = sshll.u32 %s1594_s12, 4  ;;  %s1490_s23 = int_to_ptr.vmem [resolvable:$false] %s1489_s23 }
 0x1fb   : > { %s1491_s15 = scalar_lea.vmem %s1490_s23, 1024  ;;  %p1492_p2 = scmp.lt.s32.totalorder %s1949_s27, %s1490_s23 }
 0x208   : > { %v614_v34 = vpop.permute.xlu0 %613 }
 0x267   : > { %v582_v28 = vpop.permute.xlu1 %581 }
 0x268   : > { %v583_v29 = vsel %vm577_vm2, %v582_v28, %v572_v11 }
 0x269   : > { %600 = vrot.lane.b32.xlu1 %v583_v29, %s1589_s6 }
 0x26b   : > { %v720_v30 = vpop.permute.xlu1 %719 }
 0x26c   : > { %v721_v31 = vsel %vm577_vm2, %v720_v30, %v706_v16 }
 0x26d   : > { %603 = vrot.lane.b32.xlu1 %v583_v29, %s1590_s17  ;;  %738 = vrot.lane.b32.xlu0 %v721_v31, %s1589_s6  ;;  %s974_s6 = scalar_lea.sflag [#allocation5], %s1855_s25 }
 0x271   : > { %741 = vrot.lane.b32.xlu1 %v721_v31, %s1590_s17  ;;  %s1485_s17 = scalar_lea.vmem %s1949_s27, 512 }
 0x272   : > { %p1486_p10 = scmp.ne.s32.totalorder %s1949_s27, %s1485_s17  ;;  %p1493_p4 = scmp.lt.s32.totalorder %s1491_s15, %s1485_s17 }
 0x274   : > { %p1487_p9 = pnand %p1486_p10, %p2043_p13  ;;  %p1494_p6 = por %p1493_p4, %p1492_p2 }
 0x276   : > { %p1488_p7 = pneg %p1487_p9 }
 0x278   : > { %p1495_p1 = pnand %p1494_p6, %p1488_p7 }
 0x2db   : > { %v601_v33 = vpop.permute.xlu1 %600 }
 0x2df   : > { %v604_v37 = vpop.permute.xlu1 %603  ;;  %v739_v42 = vpop.permute.xlu0 %738 }
 0x2e0   : > { %v606_v38 = vsel %vm598_vm4, %v601_v33, %v604_v37 }
 0x2e1   : > { %v608_v40 = vmul.f32 %v606_v38, %v508_v36 }
 0x2e3   : > { %v609_v41 = vadd.f32 %v608_v40, %v607_v39  ;;  %v742_v43 = vpop.permute.xlu1 %741 }
 0x2e4   : > { %v744_v44 = vsel %vm598_vm4, %v739_v42, %v742_v43 }
 0x2e5   : > { %v616_v45 = vmul.f32 %v614_v34, %v609_v41  ;;  %v746_v47 = vmul.f32 %v744_v44, %v508_v36 }
 0x2e7   : > { %v617_v48 = vpack.c.bf16 %v616_v45, %v616_v45  ;;  %v747_v49 = vadd.f32 %v746_v47, %v745_v46 }
 0x2e9   : > { %619 = vst.msk [vmem:[#allocation2] sm:$0xf] %vm618_vm5, %v617_v48  ;;  %628 = vrot.lane.b32.xlu1 %v617_v48, %s1591_s18  ;;  %623 = vrot.lane.b32.xlu0 %v617_v48, %s1592_s20  ;;  %v748_v50 = vpack.c.bf16 %v747_v49, %v747_v49 }
 0x2ed   : > { %819 = vrot.lane.b32.xlu1 %v748_v50, %s1592_s20  ;;  %633 = vrot.lane.b32.xlu0 %v617_v48, %s1593_s28 }
 0x2f0   : > { %v766_v51 = vld [vmem:[#allocation2] sm:$0xf] }
 0x2f1   : > { %923 = vrot.lane.b32.xlu1 %v748_v50, %s1593_s28  ;;  %871 = vrot.lane.b32.xlu0 %v748_v50, %s1591_s18  ;;  %v772_v52 = vsel %vm767_vm6, %v766_v51, 0 }
 0x2f2   : > { %1242 = vmatpush3.bf16.xpose.msra.mxu0 %v772_v52 }
 0x2f3   : > { %1253 = vmatprep.subr.bf16.mxu0 %v1585_v0 }
 0x2f9   : > { %1244 = vmatmul.mubr.msk.bf16.vlgmr.msra.gmra.mrb[4].mxu0 %vm767_vm6, %v748_v50 }
 0x2fa   : > { %1255 = vmatprep.mubr.msk.bf16.mxu0 %vm1586_vm0, %v1585_v0 }
 0x35b   : > { %v629_v59 = vpop.permute.xlu1 %628  ;;  %v624_v60 = vpop.permute.xlu0 %623 }
 0x35c   : > { %632 = vst.msk [vmem:[#allocation2 + $0x8] sm:$0xf] %vm618_vm5, %v629_v59  ;;  %627 = vst.msk [vmem:[#allocation2 + $0x4] sm:$0xf] %vm618_vm5, %v624_v60 }
 0x35f   : > { %v634_v61 = vpop.permute.xlu0 %633  ;;  %v820_v4 = vpop.permute.xlu1 %819 }
 0x360   : > { %637 = vst.msk [vmem:[#allocation2 + $0xc] sm:$0xf] %vm618_vm5, %v634_v61 }
 0x363   : > { %v817_v62 = vld [vmem:[#allocation2 + $0x4] sm:$0xf]  ;;  %v870_v63 = vld [vmem:[#allocation2 + $0x8] sm:$0xf]  ;;  %v872_v5 = vpop.permute.xlu0 %871  ;;  %v924_v7 = vpop.permute.xlu1 %923 }
 0x364   : > { %v825_v1 = vsel %vm767_vm6, %v817_v62, 0  ;;  %v877_v2 = vsel %vm767_vm6, %v870_v63, 0 }
 0x365   : > { %1248 = vmatpush3.bf16.xpose.msra.mxu1 %v825_v1  ;;  %1254 = vmatpush3.bf16.xpose.msra.mxu0 %v877_v2 }
 0x366   : > { %1259 = vmatprep.subr.bf16.mxu1 %v1585_v0 }
 0x367   : > { %v922_v3 = vld [vmem:[#allocation2 + $0xc] sm:$0xf] }
 0x368   : > { %v929_v6 = vsel %vm767_vm6, %v922_v3, 0 }
 0x36c   : > { %1250 = vmatmul.mubr.msk.bf16.vlgmr.msra.gmra.mrb[4].mxu1 %vm767_vm6, %v820_v4  ;;  %1256 = vmatmul.mubr.msk.bf16.vlgmr.msra.gmra.mrb[8].mxu0 %vm767_vm6, %v872_v5 }
 0x36d   : > { %1260 = vmatpush3.bf16.xpose.msra.mxu1 %v929_v6  ;;  %1261 = vmatprep.mubr.msk.bf16.mxu1 %vm1586_vm0, %v1585_v0 }
 0x374   : > { %1262 = vmatmul.mubr.msk.bf16.vlgmr.msra.gmra.mrb[8].mxu1 %vm767_vm6, %v924_v7 }
 0x3cc   : > { %v808_v9 = vpop.f32.mrb[4].mxu0 }
 0x3cd   : > { %v809_v10 = vadd.f32 %v808_v9, %v765_v8  ;;  %v1245_v11 = vpop.f32.mrb[5].mxu0 }
 0x3ce   : > { %v811_v12 = vpop.f32.mrb[6].mxu0 }
 0x3cf   : > { %815 = vst.msk [vmem:[%s486_s29] sm:$0xff] %vm814_vm7, %v809_v10  ;;  %v1246_v13 = vpop.f32.mrb[7].mxu0 }
 0x43f   : > { %v861_v14 = vpop.f32.mrb[4].mxu1  ;;  %v913_v15 = vpop.f32.mrb[8].mxu0 }
 0x440   : > { %v862_v16 = vadd.f32 %v861_v14, %v765_v8  ;;  %v914_v17 = vadd.f32 %v913_v15, %v765_v8  ;;  %v1251_v0 = vpop.f32.mrb[5].mxu1  ;;  %v1257_v18 = vpop.f32.mrb[9].mxu0 }
 0x441   : > { %v864_v19 = vpop.f32.mrb[6].mxu1  ;;  %v916_v20 = vpop.f32.mrb[10].mxu0 }
 0x442   : > { %1199 = vst.msk [vmem:[%s486_s29 + $0x8] sm:$0xff] %vm814_vm7, %v862_v16  ;;  %1201 = vst.msk [vmem:[%s486_s29 + $0x10] sm:$0xff] %vm814_vm7, %v914_v17  ;;  %v1252_v21 = vpop.f32.mrb[7].mxu1  ;;  %v1258_v22 = vpop.f32.mrb[11].mxu0 }
 0x447   : > { %v965_v23 = vpop.f32.mrb[8].mxu1 }
 0x448   : > { %v966_v24 = vadd.f32 %v965_v23, %v765_v8  ;;  %v1263_v25 = vpop.f32.mrb[9].mxu1 }
 0x449   : > { %v968_v26 = vpop.f32.mrb[10].mxu1 }
 0x44a   : > { %1203 = vst.msk [vmem:[%s486_s29 + $0x18] sm:$0xff] %vm814_vm7, %v966_v24  ;;  %v1264_v27 = vpop.f32.mrb[11].mxu1 }
 0x44b   : > { %1498 = shalt.err (!%p1495_p1)
}
 0x44c   : > { %s1499_s22 = scalar_lea.hbm %s1954_s0, 512  ;;  %s1503_s20 = scalar_lea.hbm %s2013_s9, 1024 }
 0x44d   : > { %p1500_p8 = scmp.ne.s32.totalorder %s1954_s0, %s1499_s22  ;;  %p1504_p11 = scmp.lt.u32.totalorder %s1954_s0, %s2013_s9 }
 0x44e   : > { %p1505_p0 = scmp.lt.u32.totalorder %s1503_s20, %s1499_s22  ;;  %p1507_p10 = scmp.lt.u32.totalorder %s1499_s22, %s1954_s0 }
 0x44f   : > { %p1501_p12 = pnand %p1500_p8, %p2043_p13 }
 0x450   : > { %p1506_p5 = por %p1505_p0, %p1504_p11 }
 0x451   : > { %p1502_p3 = pneg %p1501_p12 }
 0x452   : > { %p1508_p9 = por %p1507_p10, %p1506_p5 }
 0x454   : > { %p1509_p7 = pnand %p1508_p9, %p1502_p3 }
 0x456   : > { %1512 = shalt.err (!%p1509_p7)
}
 0x457   : > { %s1595_s29 = smov 128   ;;  %s1596_s5 = smov 8  }
 0x458   : > { %1277 = dma.vmem_to_hbm [thread:$0]  (%p2043_p13), %s1949_s27, 512, %s1954_s0, %s974_s6, %s1595_s29, %s1595_s29, %s1596_s5  }
 0x459 PF: > { %s2044_s26 = sld [smem:[#allocation17_spill]]  ;;  %s1005_s16 = sand.u32 1, %s1559_s30  }
 0x45a   : > { %p2046_p4 = scmp.ge.s32.totalorder %s1579_s14, 2  ;;  %s1006_s17 = scalar_lea.sflag [#allocation5], %s1005_s16 }
 0x45f   : > { %p2045_p2 = scmp.ne.s32.totalorder %s2044_s26, 0 }
 0x461   : > { %p1294_p6 = pnand %p2046_p4, %p2045_p2 }
 0x463   : > { %1554 = dma.done.wait (!%p1294_p6), %s1006_s17, 512  }
 0x464   : > { %1556 = vsyncadd (!%p1294_p6), %s1006_s17, 4294966784  ;;  %s29_s14 = sadd.s32 1, %s1579_s14   ;;  %s2047_s12 = sld [smem:[#allocation19_spill]] }
 0x465   : > { %p26_p1 = scmp.ge.s32.totalorder %s29_s14, 4   ;;  %s2048_s24 = sld [smem:[#allocation18_spill]] }
 0x466   : > { %s2049_s30 = smov %s1563_s10  ;;  %s2050_s10 = smov %s1567_s11 }
 0x467   :  { %28 = sbr.rel (!%p26_p1) target bundleno = 13 (0xd), region = 149 }
 0x46a   : > { %s2051_s11 = smov %s2047_s12  ;;  %s2052_s12 = smov %s1575_s13 }
 0x46b   : > { %s2053_s13 = smov %s2048_s24 }
 0x46e   :  { %1011 = vsyncpa [#allocation4], 1 }
 0x46f   :  { %1013 = vsyncpa [#allocation4 + $0x1], 1 }
 0x470   :  { %1014 = vsyncpa [#allocation7], 1 }
 0x471   :  { %1016 = vsyncpa [#allocation7 + $0x1], 1 }
 0x472   :  { %1017 = vsyncpa [#allocation10], 1 }
 0x473   :  { %1018 = vsyncpa [#allocation5], 1 }
 0x474   :  { %1020 = vsyncpa [#allocation5 + $0x1], 1 }

</bundles_post_ra>
